<compile_context>
chip_gen: v7x
topology: tpu7x:2x2x1
jax: 0.10.0
libtpu: 0.0.40
codegen_flags: <defaults>
</compile_context>

<pallas_src>
import functools
import math

import jax
import jax.numpy as jnp
from jax.experimental import pallas as pl
from jax.experimental.pallas import tpu as pltpu
import numpy as np


def _gelu_exact(x):
    # Exact GELU (matches torch.nn.GELU default): 0.5 * x * (1 + erf(x / sqrt(2)))
    return 0.5 * x * (1.0 + jax.lax.erf(x * (1.0 / math.sqrt(2.0))))


def _round_up(x, m):
    return ((x + m - 1) // m) * m


def _choose_tb(b, d, itemsize, max_tb=2048):
    """Pick a large batch tile bounded by a conservative VMEM budget.

    The x tile is double-buffered (2 * tb * d * itemsize bytes); a 16 MiB
    budget keeps us well inside the scoped VMEM limit on every generation
    (v7x has only 64 MiB physical / 32 MiB default scoped per TensorCore).
    """
    sublane = 8 if itemsize >= 4 else 16
    budget = 16 * 1024 * 1024
    cap = max(sublane, (budget // (2 * d * itemsize)) // sublane * sublane)
    tb = min(max_tb, cap, _round_up(b, sublane))
    # Keep >=2 grid steps when the batch is big enough so the "parallel" batch
    # axis can shard across the two TensorCores of a v7x chip.
    if b > 2 * sublane and pl.cdiv(b, tb) < 2:
        tb = max(sublane, _round_up((b + 1) // 2, sublane))
    return tb


def post_emb_factorization_kernel(x_ref, w_ref, b_ref, wd_ref, o_ref, *, dim):
    x = x_ref[...]                                                       # (TB, D)
    # Fused matmul for both branches: columns [0:dim] are MF.U, [dim:] are the
    # linear head.  One MXU pass instead of two (fill/drain dominated at these
    # widths).
    y = jnp.dot(x, w_ref[...], preferred_element_type=jnp.float32) + b_ref[...]
    # MF branch.  The reference splits the hidden in two halves and applies
    # act1/act2; with act='gelu' both halves use the same GELU, so it is
    # equivalent to GELU on the whole hidden tensor.
    h = _gelu_exact(y[:, :dim])                                          # (TB, dim)
    # MF.diag (out_dim=1, no bias) as a VPU multiply + cross-lane reduce
    # instead of a width-1 MXU matmul.
    mf = jnp.sum(h * wd_ref[...], axis=-1, keepdims=True)                # (TB, 1)
    lin = y[:, dim:]                                                     # (TB, out_dim)
    o_ref[...] = (lin + mf).astype(o_ref.dtype)                          # broadcast over out_dim


def post_emb_factorization(x, params, x_cont=None, y_index=None, tb=None):
    """x: (B, F, E).  params = (W_lin (D,out), b_lin (1,out), W_u (D,dim),
    b_u (1,dim), W_diag (dim,1)).  Returns (B, out_dim)."""
    if x_cont is not None:
        x = jnp.concatenate((x, x_cont), axis=1)
    if y_index is not None:
        f = x.shape[1]
        keep = np.arange(f) != y_index
        x = x[:, keep]
    b = x.shape[0]
    xf = x.reshape(b, -1)                                                # (B, D)
    d = xf.shape[1]

    wl, bl, wu, bu, wd = params
    out_dim = wl.shape[1]
    dim = wu.shape[1]

    # Pack weights/biases: MF.U columns first, linear columns second so the
    # hidden slice starts at lane 0.
    w_pack = jnp.concatenate((wu, wl), axis=1)                           # (D, dim+out_dim)
    b_pack = jnp.concatenate((bu, bl), axis=1)                           # (1, dim+out_dim)
    wd_row = wd.reshape(1, dim)                                          # (1, dim)

    if tb is None:
        tb = _choose_tb(b, d, xf.dtype.itemsize)

    grid = (pl.cdiv(b, tb),)
    kern = functools.partial(post_emb_factorization_kernel, dim=dim)
    return pl.pallas_call(
        kern,
        out_shape=jax.ShapeDtypeStruct((b, out_dim), xf.dtype),
        grid=grid,
        in_specs=[
            pl.BlockSpec((tb, d), lambda i: (i, 0)),                     # x tile over batch
            pl.BlockSpec((d, dim + out_dim), lambda i: (0, 0)),          # [W_u | W_lin]
            pl.BlockSpec((1, dim + out_dim), lambda i: (0, 0)),          # [b_u | b_lin]
            pl.BlockSpec((1, dim), lambda i: (0, 0)),                    # W_diag row
        ],
        out_specs=pl.BlockSpec((tb, out_dim), lambda i: (i, 0)),
        compiler_params=pltpu.CompilerParams(dimension_semantics=("parallel",)),
    )(xf, w_pack, b_pack, wd_row)


if __name__ == "__main__":
    # Small shapes consistent with the module: B=8 rows, F=4 categorical
    # features, E=8 embedding dim -> emb_cat_dim = 32, hidden dim = 32, out_dim = 4.
    B, F, E = 8, 4, 8
    D = F * E
    DIM, OUT_DIM = 32, 4

    key = jax.random.PRNGKey(0)
    ks = jax.random.split(key, 6)
    x = jax.random.normal(ks[0], (B, F, E), dtype=jnp.float32)

    # Deterministic parameter init (shapes match nn.Linear layers in __init__).
    wl = jax.random.normal(ks[1], (D, OUT_DIM), dtype=jnp.float32) * (1.0 / math.sqrt(D))
    bl = jax.random.normal(ks[2], (1, OUT_DIM), dtype=jnp.float32) * 0.1
    wu = jax.random.normal(ks[3], (D, DIM), dtype=jnp.float32) * (1.0 / math.sqrt(D))
    bu = jax.random.normal(ks[4], (1, DIM), dtype=jnp.float32) * 0.1
    wd = jax.random.normal(ks[5], (DIM, 1), dtype=jnp.float32) * (1.0 / math.sqrt(DIM))
    params = (wl, bl, wu, bu, wd)

    # TODO(synk): nn.Dropout(p=0.0) is an identity at inference and is omitted.
    out = post_emb_factorization(x, params, x_cont=None, y_index=None)
    out = jax.block_until_ready(out)

    # Pure-JAX reference for correctness.
    xf = x.reshape(B, -1)
    ref = (xf @ wl + bl) + _gelu_exact(xf @ wu + bu) @ wd
    assert out.shape == (B, OUT_DIM)
    assert jnp.allclose(out, ref, atol=1e-5, rtol=1e-5), float(jnp.max(jnp.abs(out - ref)))

    # Also exercise a batch that needs multiple grid steps + padded last tile.
    B2 = 300
    x2 = jax.random.normal(jax.random.PRNGKey(1), (B2, F, E), dtype=jnp.float32)
    out2 = jax.block_until_ready(post_emb_factorization(x2, params))
    xf2 = x2.reshape(B2, -1)
    ref2 = (xf2 @ wl + bl) + _gelu_exact(xf2 @ wu + bu) @ wd
    assert out2.shape == (B2, OUT_DIM)
    assert jnp.allclose(out2, ref2, atol=1e-5, rtol=1e-5), float(jnp.max(jnp.abs(out2 - ref2)))

    print("KERNEL_OK")
</pallas_src>

<mosaic_0001>
module attributes {stable_mosaic.version = 11 : i64} {
  func.func @post_emb_factorization_kernel(%arg0: i32, %arg1: memref<8x32xf32, #tpu.memory_space<vmem>>, %arg2: memref<32x36xf32, #tpu.memory_space<vmem>>, %arg3: memref<1x36xf32, #tpu.memory_space<vmem>>, %arg4: memref<1x32xf32, #tpu.memory_space<vmem>>, %arg5: memref<8x4xf32, #tpu.memory_space<vmem>>) attributes {dimension_semantics = [#tpu.dimension_semantics<parallel>], iteration_bounds = array<i64: 1>, scalar_prefetch = 0 : i64, scratch_operands = 0 : i64, tpu.core_type = #tpu.core_type<tc>, window_params = [{transform_indices = @transform_0, window_bounds = array<i64: 8, 32>}, {pipeline_mode = #tpu.pipeline_mode<synchronous>, transform_indices = @transform_1, window_bounds = array<i64: 32, 36>}, {pipeline_mode = #tpu.pipeline_mode<synchronous>, transform_indices = @transform_2, window_bounds = array<i64: 1, 36>}, {pipeline_mode = #tpu.pipeline_mode<synchronous>, transform_indices = @transform_3, window_bounds = array<i64: 1, 32>}, {transform_indices = @transform_4, window_bounds = array<i64: 8, 4>}]} {
    %c0 = arith.constant 0 : index
    %c0_0 = arith.constant 0 : index
    %0 = vector.load %arg1[%c0, %c0_0] : memref<8x32xf32, #tpu.memory_space<vmem>>, vector<8x32xf32>
    %c0_1 = arith.constant 0 : index
    %c0_2 = arith.constant 0 : index
    %1 = vector.load %arg2[%c0_1, %c0_2] : memref<32x36xf32, #tpu.memory_space<vmem>>, vector<32x36xf32>
    %cst = arith.constant dense<0.000000e+00> : vector<8x36xf32>
    %2 = tpu.matmul %0, %1, %cst {dimension_numbers = #tpu.dot_dimension_numbers<[1], [0], [0], [1], [0, 0, 1, 1], [], []>} : vector<8x32xf32>, vector<32x36xf32>, vector<8x36xf32> -> vector<8x36xf32>
    %c0_3 = arith.constant 0 : index
    %c0_4 = arith.constant 0 : index
    %3 = vector.load %arg3[%c0_3, %c0_4] : memref<1x36xf32, #tpu.memory_space<vmem>>, vector<1x36xf32>
    %4 = vector.broadcast %3 : vector<1x36xf32> to vector<8x36xf32>
    %5 = arith.addf %2, %4 : vector<8x36xf32>
    %6 = vector.extract_strided_slice %5 {offsets = [0, 0], sizes = [8, 32], strides = [1, 1]} : vector<8x36xf32> to vector<8x32xf32>
    %cst_5 = arith.constant 5.000000e-01 : f32
    %7 = vector.broadcast %cst_5 : f32 to vector<8x32xf32>
    %8 = arith.mulf %7, %6 : vector<8x32xf32>
    %cst_6 = arith.constant 0.707106769 : f32
    %9 = vector.broadcast %cst_6 : f32 to vector<8x32xf32>
    %10 = arith.mulf %6, %9 : vector<8x32xf32>
    %11 = math.erf %10 : vector<8x32xf32>
    %cst_7 = arith.constant 1.000000e+00 : f32
    %12 = vector.broadcast %cst_7 : f32 to vector<8x32xf32>
    %13 = arith.addf %12, %11 : vector<8x32xf32>
    %14 = arith.mulf %8, %13 : vector<8x32xf32>
    %c0_8 = arith.constant 0 : index
    %c0_9 = arith.constant 0 : index
    %15 = vector.load %arg4[%c0_8, %c0_9] : memref<1x32xf32, #tpu.memory_space<vmem>>, vector<1x32xf32>
    %16 = vector.broadcast %15 : vector<1x32xf32> to vector<8x32xf32>
    %17 = arith.mulf %14, %16 : vector<8x32xf32>
    %cst_10 = arith.constant dense<0.000000e+00> : vector<8xf32>
    %18 = vector.multi_reduction <add>, %17, %cst_10 [1] : vector<8x32xf32> to vector<8xf32>
    %19 = vector.shape_cast %18 : vector<8xf32> to vector<8x1xf32>
    %20 = vector.extract_strided_slice %5 {offsets = [0, 32], sizes = [8, 4], strides = [1, 1]} : vector<8x36xf32> to vector<8x4xf32>
    %21 = vector.broadcast %19 : vector<8x1xf32> to vector<8x4xf32>
    %22 = arith.addf %20, %21 : vector<8x4xf32>
    %c0_11 = arith.constant 0 : index
    %c0_12 = arith.constant 0 : index
    %23 = vector.load %arg5[%c0_11, %c0_12] : memref<8x4xf32, #tpu.memory_space<vmem>>, vector<8x4xf32>
    tpu.vector_store %arg5[%c0_11, %c0_12], %22 {strides = array<i32>} : memref<8x4xf32, #tpu.memory_space<vmem>>, vector<8x4xf32>,
    return
  }
  func.func @transform_0(%arg0: i32) -> (i32, i32) {
    %c0_i32 = arith.constant 0 : i32
    %c0_i32_0 = arith.constant 0 : i32
    return %arg0, %c0_i32 : i32, i32
  }
  func.func @transform_1(%arg0: i32) -> (i32, i32) {
    %c0_i32 = arith.constant 0 : i32
    %c0_i32_0 = arith.constant 0 : i32
    %c0_i32_1 = arith.constant 0 : i32
    return %c0_i32, %c0_i32_0 : i32, i32
  }
  func.func @transform_2(%arg0: i32) -> (i32, i32) {
    %c0_i32 = arith.constant 0 : i32
    %c0_i32_0 = arith.constant 0 : i32
    %c0_i32_1 = arith.constant 0 : i32
    return %c0_i32, %c0_i32_0 : i32, i32
  }
  func.func @transform_3(%arg0: i32) -> (i32, i32) {
    %c0_i32 = arith.constant 0 : i32
    %c0_i32_0 = arith.constant 0 : i32
    %c0_i32_1 = arith.constant 0 : i32
    return %c0_i32, %c0_i32_0 : i32, i32
  }
  func.func @transform_4(%arg0: i32) -> (i32, i32) {
    %c0_i32 = arith.constant 0 : i32
    %c0_i32_0 = arith.constant 0 : i32
    return %arg0, %c0_i32 : i32, i32
  }
}

</mosaic_0001>

<bundles_post_ra>
// kernel: tpu_custom_call.1
= control target key start
LH: loop header
LB: loop body
LE: loop exit
PB: predicated region body
PF: predicated region fallthrough
CT: control target
= control target key end

     0   :  { %9 = vsyncpa [#allocation3], 0  ;;  %s314_s0 = inlined_call_operand.hbm [shape: f32[8,32], index: 0, kind: input, shape index: {}]   ;;  %s315_s1 = inlined_call_operand.hbm [shape: f32[32,36], index: 1, kind: input, shape index: {}]   ;;  %s316_s2 = inlined_call_operand.vmem [shape: f32[1,36], index: 2, kind: input, shape index: {}]   ;;  %s317_s3 = inlined_call_operand.vmem [shape: f32[1,32], index: 3, kind: input, shape index: {}]   ;;  %s318_s4 = inlined_call_operand.vmem [shape: f32[8,4], index: 4, kind: output, shape index: {}]  }
   0x1   :  { %10 = vsyncpa [#allocation5], 0  ;;  %s241_s15 = smov [#allocation2]   ;;  %s242_s17 = smov [#allocation4]  }
   0x2   :  { %s17_s16 = sshll.u32 %s241_s15, 4  ;;  %s26_s18 = sshll.u32 %s242_s17, 4  ;;  %s18_s16 = int_to_ptr.vmem [resolvable:$true] %s17_s16  ;;  %s274_s18 = int_to_ptr.vmem [resolvable:$true] %s26_s18 }
   0x3   :  { %s193_s21 = scalar_lea.hbm %s314_s0, 128 }
   0x4   :  { %p194_p0 = scmp.ne.s32.totalorder %s314_s0, %s193_s21  ;;  %p197_p1 = scmp.lt.u32.totalorder %s193_s21, %s314_s0 }
   0x6   :  { %p199_p2 = pnand %p197_p1, %p194_p0 }
   0x8   :  { %202 = shalt.err (!%p199_p2)
}
   0x9   :  { %s203_s26 = scalar_lea.vmem %s18_s16, 128  ;;  %p208_p4 = scmp.lt.s32.totalorder %s18_s16, %s18_s16 }
   0xa   :  { %p204_p3 = scmp.ne.s32.totalorder %s18_s16, %s203_s26  ;;  %p209_p5 = scmp.lt.s32.totalorder %s203_s26, %s203_s26 }
   0xc   :  { %p210_p6 = por %p209_p5, %p208_p4 }
   0xe   :  { %p211_p7 = pnand %p210_p6, %p204_p3 }
  0x10   :  { %214 = shalt.err (!%p211_p7)
}
  0x11   :  { %20 = dma.hbm_to_vmem [thread:$0]  %s314_s0, 128, %s18_s16, [#allocation3]  }
  0x12   :  { %s215_s5 = scalar_lea.hbm %s315_s1, 512 }
  0x13   :  { %p216_p8 = scmp.ne.s32.totalorder %s315_s1, %s215_s5  ;;  %p219_p9 = scmp.lt.u32.totalorder %s215_s5, %s315_s1 }
  0x15   :  { %p221_p10 = pnand %p219_p9, %p216_p8 }
  0x17   :  { %224 = shalt.err (!%p221_p10)
}
  0x18   :  { %s225_s10 = scalar_lea.vmem %s274_s18, 512  ;;  %p230_p12 = scmp.lt.s32.totalorder %s274_s18, %s274_s18 }
  0x19   :  { %p226_p11 = scmp.ne.s32.totalorder %s274_s18, %s225_s10  ;;  %p231_p13 = scmp.lt.s32.totalorder %s225_s10, %s225_s10 }
  0x1b   :  { %p232_p0 = por %p231_p13, %p230_p12 }
  0x1d   :  { %p233_p1 = pnand %p232_p0, %p226_p11 }
  0x1f   :  { %236 = shalt.err (!%p233_p1)
}
  0x20   :  { %s243_s0 = smov 128   ;;  %s244_s11 = smov 8  }
  0x21   :  { %32 = dma.hbm_to_vmem [thread:$0]  %s315_s1, 512, %s274_s18, [#allocation5], %s243_s0, %s243_s0, %s244_s11  }
  0x22   :  { %237 = dma.done.wait [#allocation3], 128  }
  0x23   :  { %238 = vsyncadd [#allocation3], 4294967168 }
  0x24   :  { %239 = dma.done.wait [#allocation5], 512  }
  0x25   :  { %240 = vsyncadd [#allocation5], 4294966784  ;;  %v245_v0 = vmov 0.0|0.0   ;;  %vm246_vm0 = vmmov 0   ;;  %v247_v1 = vmov 0.0   ;;  %v44_v2 = vld [vmem:[#allocation4] sm:$0xff] }
  0x26   :  { %177 = vmatprep.subr.bf16.mxu0 %v245_v0  ;;  %174 = vmatprep.mubr.msk.f32.mxu0 %vm246_vm0, %v247_v1  ;;  %v45_v3 = vld [vmem:[#allocation4 + $0x8] sm:$0xff]  ;;  %v46_v4 = vld [vmem:[#allocation4 + $0x10] sm:$0xff]  ;;  %v47_v6 = vld [vmem:[#allocation4 + $0x18] sm:$0xff]  ;;  %vm55_vm1 = vcmask 261120   ;;  %s248_s17 = smov 96   ;;  %vm150_vm2 = vcmask 31744  }
  0x27   :  { %v178_v5 = vpack.c.bf16 %v45_v3, %v44_v2  ;;  %v181_v7 = vpack.c.bf16 %v47_v6, %v46_v4  ;;  %v43_v8 = vld [vmem:[#allocation2] sm:$0xff]  ;;  %v158_v9 = vld [vmem:[%s316_s2] ss:$0 sm:$0xff] }
  0x28   :  { %v160_v17 = vld [vmem:[%s317_s3] ss:$0 sm:$0xff] }
  0x29   :  { %179 = vmatpush3.bf16.msra.mxu0 %v178_v5 }
  0x2a   :  { %180 = vmatprep.subr.bf16.mxu0 %v245_v0 }
  0x2d   :  { %182 = vmatpush3.bf16.msra.mxu0 %v181_v7 }
  0x30   :  { %175 = vmatmul.mubr.msk.f32.vlgmr.msra.gmra.mrb[0].mxu0 %vm55_vm1, %v43_v8 }
 0x103   :  { %v125_v10 = vpop.f32.mrb[0].mxu0 }
 0x104   :  { %v126_v11 = vadd.f32 %v158_v9, %v125_v10  ;;  %v176_v12 = vpop.f32.mrb[1].mxu0 }
 0x106   :  { %v130_v13 = vmul.f32 0.70710677, %v126_v11  ;;  %v129_v15 = vmul.f32 0.5, %v126_v11 }
 0x108   :  { %191 = verf.f32 %v130_v13 }
 0x112   :  { %v192_v14 = vpop.eup %191 }
 0x113   :  { %v132_v16 = vadd.f32 1.0, %v192_v14 }
 0x115   :  { %v133_v18 = vmul.f32 %v132_v16, %v129_v15 }
 0x117   :  { %v141_v19 = vmul.f32 %v160_v17, %v133_v18 }
 0x119   :  { %v142_v20 = vsel %vm55_vm1, %v141_v19, 0.0 }
 0x11a   :  { %143 = vadd.xlane.f32.xlu0 %v142_v20 }
 0x1a7   :  { %v144_v21 = vpop.xlane.xlu0 %143 }
 0x1a8   :  { %v145_v22 = vadd.f32 %v144_v21, %v126_v11 }
 0x1aa   :  { %147 = vrot.lane.b32.xlu0 %v145_v22, %s248_s17 }
 0x21c   :  { %v148_v23 = vpop.permute.xlu0 %147 }
 0x21d   :  { %151 = vst.msk [vmem:[%s318_s4] sm:$0xff] %vm150_vm2, %v148_v23 }
 0x21e   :  { %156 = vsyncpa [#allocation3], 1 }
 0x21f   :  { %157 = vsyncpa [#allocation5], 1 }

</bundles_post_ra>
